<compile_context>
chip_gen: v6e
topology: v6e:2x2x1
jax: 0.10.0
libtpu: 0.0.40
codegen_flags: <defaults>
</compile_context>

<pallas_src>
import jax
import jax.numpy as jnp
import numpy as np
from jax.experimental import pallas as pl
from jax.experimental.pallas import tpu as pltpu


def sg_envmap_kernel(lobes_ref, lam_ref, mus_t_ref, v_ref, o_ref):
    # SG tables: constant block index -> resident in VMEM, preprocessed already.
    lobes = lobes_ref[...]                       # (M, 3) unit lobe directions
    lam = lam_ref[...]                           # (M, 1) |lambda|
    mus_t = mus_t_ref[...]                       # (3, M) |mu| transposed (rgb x SG)

    v = v_ref[...]                               # (3, TN) rays on the lane axis

    # Per-axis broadcast MACs on the VPU instead of a K=3 MXU matmul.
    lx = lobes[:, 0:1]                           # (M, 1) -> broadcast over lanes
    ly = lobes[:, 1:2]
    lz = lobes[:, 2:3]
    vx = v[0:1, :]                               # (1, TN) -> broadcast over sublanes
    vy = v[1:2, :]
    vz = v[2:3, :]

    dots = lx * vx + ly * vy + lz * vz           # (M, TN) ray . lobe
    e = jnp.exp(lam * (dots - 1.0))              # (M, TN), EUP transcendental
    # Reduction over the M SGs, weighted by mus: (3, M) @ (M, TN) -> (3, TN).
    refl = jnp.dot(mus_t, e, preferred_element_type=jnp.float32)
    o_ref[...] = refl.astype(o_ref.dtype)


def sg_envmap(lgtSGs, viewdirs, *, tile_n=4096):
    """Forward pass of SGEnvmap: viewdirs (N, 3) -> reflection (N, 3)."""
    N, three = viewdirs.shape
    assert three == 3
    M, seven = lgtSGs.shape
    assert seven == 7

    # --- Hoisted SG preprocessing (tiny, once per call, outside the tile loop).
    sg = lgtSGs.astype(jnp.float32)
    raw_lobes = sg[:, 0:3]
    norm = jnp.sqrt(jnp.sum(raw_lobes * raw_lobes, axis=-1, keepdims=True))
    lobes = raw_lobes / (norm + 1e-7)            # (M, 3)
    lambdas = jnp.abs(sg[:, 3:4])                # (M, 1)
    mus_t = jnp.abs(sg[:, 4:7]).T                # (3, M)

    # --- Lane-dense layout: rays on the 128-lane axis.
    v_t = viewdirs.astype(jnp.float32).T         # (3, N)

    # Lane-aligned ray tile: as large as requested, but keep grid length >= 2
    # when possible so both v7x TensorCores get work under "parallel" semantics.
    lane_groups = pl.cdiv(N, 128)
    groups_per_tile = min(max(tile_n // 128, 1), max(lane_groups // 2, 1))
    tn = 128 * groups_per_tile
    n_tiles = pl.cdiv(N, tn)
    n_pad = n_tiles * tn
    if n_pad != N:
        # Zero-padded rays give exp(-lambda) <= 1 (no overflow) and are sliced off.
        v_t = jnp.pad(v_t, ((0, 0), (0, n_pad - N)))

    cost = pl.CostEstimate(
        flops=2 * N * M * 6,
        transcendentals=N * M,
        bytes_accessed=24 * N + 4 * lgtSGs.size,
    )

    out_t = pl.pallas_call(
        sg_envmap_kernel,
        out_shape=jax.ShapeDtypeStruct((3, n_pad), jnp.float32),
        grid_spec=pltpu.PrefetchScalarGridSpec(
            num_scalar_prefetch=0,
            grid=(n_tiles,),
            in_specs=[
                pl.BlockSpec((M, 3), lambda i: (0, 0)),    # lobes   (resident)
                pl.BlockSpec((M, 1), lambda i: (0, 0)),    # lambdas (resident)
                pl.BlockSpec((3, M), lambda i: (0, 0)),    # mus^T   (resident)
                pl.BlockSpec((3, tn), lambda i: (0, i)),   # ray tile (lane-dense)
            ],
            out_specs=pl.BlockSpec((3, tn), lambda i: (0, i)),
        ),
        compiler_params=pltpu.CompilerParams(
            dimension_semantics=("parallel",)),
        cost_estimate=cost,
    )(lobes, lambdas, mus_t, v_t)

    return out_t[:, :N].T.astype(viewdirs.dtype)


def sg_envmap_ref(lgtSGs, viewdirs):
    lobes = lgtSGs[:, :3] / (
        jnp.linalg.norm(lgtSGs[:, :3], axis=-1, keepdims=True) + 1e-7)
    lambdas = jnp.abs(lgtSGs[:, 3:4])
    mus = jnp.abs(lgtSGs[:, -3:])
    pred = mus[None] * jnp.exp(
        lambdas[None] * (
            jnp.sum(viewdirs[:, None, :] * lobes[None], axis=-1, keepdims=True)
            - 1.0))
    return jnp.sum(pred, axis=1)


if __name__ == "__main__":
    num_sgs = 32       # numLgtSGs
    n_rays = 256       # number of view directions
    key = jax.random.PRNGKey(0)
    k_sg, k_v = jax.random.split(key)

    # Deterministic parameter init mirroring __init__ shapes: randn(M, 7),
    # lambda column scaled by 100.  (The module zeros mus at init, which would
    # make the output identically zero; we keep nonzero mus for a meaningful test.)
    lgtSGs = jax.random.normal(k_sg, (num_sgs, 7), dtype=jnp.float32)
    lgtSGs = lgtSGs.at[:, 3:4].multiply(100.0)

    # Random unit view directions.
    vd = jax.random.normal(k_v, (n_rays, 3), dtype=jnp.float32)
    vd = vd / jnp.linalg.norm(vd, axis=-1, keepdims=True)

    out = jax.block_until_ready(sg_envmap(lgtSGs, vd))
    ref = jax.block_until_ready(sg_envmap_ref(lgtSGs, vd))

    np.testing.assert_allclose(np.asarray(out), np.asarray(ref),
                               rtol=1e-5, atol=1e-6)
    print("KERNEL_OK")
</pallas_src>

<mosaic_0001>
module attributes {stable_mosaic.version = 11 : i64} {
  func.func @sg_envmap_kernel(%arg0: i32, %arg1: memref<32x3xf32, #tpu.memory_space<vmem>>, %arg2: memref<32x1xf32, #tpu.memory_space<vmem>>, %arg3: memref<3x32xf32, #tpu.memory_space<vmem>>, %arg4: memref<3x128xf32, #tpu.memory_space<vmem>>, %arg5: memref<3x128xf32, #tpu.memory_space<vmem>>) attributes {dimension_semantics = [#tpu.dimension_semantics<parallel>], iteration_bounds = array<i64: 2>, scalar_prefetch = 0 : i64, scratch_operands = 0 : i64, tpu.core_type = #tpu.core_type<tc>, window_params = [{pipeline_mode = #tpu.pipeline_mode<synchronous>, transform_indices = @transform_0, window_bounds = array<i64: 32, 3>}, {pipeline_mode = #tpu.pipeline_mode<synchronous>, transform_indices = @transform_1, window_bounds = array<i64: 32, 1>}, {pipeline_mode = #tpu.pipeline_mode<synchronous>, transform_indices = @transform_2, window_bounds = array<i64: 3, 32>}, {transform_indices = @transform_3, window_bounds = array<i64: 3, 128>}, {transform_indices = @transform_4, window_bounds = array<i64: 3, 128>}]} {
    %c0 = arith.constant 0 : index
    %c0_0 = arith.constant 0 : index
    %0 = vector.load %arg1[%c0, %c0_0] : memref<32x3xf32, #tpu.memory_space<vmem>>, vector<32x3xf32>
    %c0_1 = arith.constant 0 : index
    %c0_2 = arith.constant 0 : index
    %1 = vector.load %arg2[%c0_1, %c0_2] : memref<32x1xf32, #tpu.memory_space<vmem>>, vector<32x1xf32>
    %c0_3 = arith.constant 0 : index
    %c0_4 = arith.constant 0 : index
    %2 = vector.load %arg3[%c0_3, %c0_4] : memref<3x32xf32, #tpu.memory_space<vmem>>, vector<3x32xf32>
    %c0_5 = arith.constant 0 : index
    %c0_6 = arith.constant 0 : index
    %3 = vector.load %arg4[%c0_5, %c0_6] : memref<3x128xf32, #tpu.memory_space<vmem>>, vector<3x128xf32>
    %4 = vector.extract_strided_slice %0 {offsets = [0, 0], sizes = [32, 1], strides = [1, 1]} : vector<32x3xf32> to vector<32x1xf32>
    %5 = vector.extract_strided_slice %0 {offsets = [0, 1], sizes = [32, 1], strides = [1, 1]} : vector<32x3xf32> to vector<32x1xf32>
    %6 = vector.extract_strided_slice %0 {offsets = [0, 2], sizes = [32, 1], strides = [1, 1]} : vector<32x3xf32> to vector<32x1xf32>
    %7 = vector.extract_strided_slice %3 {offsets = [0, 0], sizes = [1, 128], strides = [1, 1]} : vector<3x128xf32> to vector<1x128xf32>
    %8 = vector.extract_strided_slice %3 {offsets = [1, 0], sizes = [1, 128], strides = [1, 1]} : vector<3x128xf32> to vector<1x128xf32>
    %9 = vector.extract_strided_slice %3 {offsets = [2, 0], sizes = [1, 128], strides = [1, 1]} : vector<3x128xf32> to vector<1x128xf32>
    %10 = vector.broadcast %4 : vector<32x1xf32> to vector<32x128xf32>
    %11 = vector.broadcast %7 : vector<1x128xf32> to vector<32x128xf32>
    %12 = arith.mulf %10, %11 : vector<32x128xf32>
    %13 = vector.broadcast %5 : vector<32x1xf32> to vector<32x128xf32>
    %14 = vector.broadcast %8 : vector<1x128xf32> to vector<32x128xf32>
    %15 = arith.mulf %13, %14 : vector<32x128xf32>
    %16 = arith.addf %12, %15 : vector<32x128xf32>
    %17 = vector.broadcast %6 : vector<32x1xf32> to vector<32x128xf32>
    %18 = vector.broadcast %9 : vector<1x128xf32> to vector<32x128xf32>
    %19 = arith.mulf %17, %18 : vector<32x128xf32>
    %20 = arith.addf %16, %19 : vector<32x128xf32>
    %cst = arith.constant 1.000000e+00 : f32
    %21 = vector.broadcast %cst : f32 to vector<32x128xf32>
    %22 = arith.subf %20, %21 : vector<32x128xf32>
    %23 = vector.broadcast %1 : vector<32x1xf32> to vector<32x128xf32>
    %24 = arith.mulf %23, %22 : vector<32x128xf32>
    %25 = math.exp %24 : vector<32x128xf32>
    %cst_7 = arith.constant dense<0.000000e+00> : vector<3x128xf32>
    %26 = tpu.matmul %2, %25, %cst_7 {dimension_numbers = #tpu.dot_dimension_numbers<[1], [0], [0], [1], [0, 0, 1, 1], [], []>} : vector<3x32xf32>, vector<32x128xf32>, vector<3x128xf32> -> vector<3x128xf32>
    %c0_8 = arith.constant 0 : index
    %c0_9 = arith.constant 0 : index
    %27 = vector.load %arg5[%c0_8, %c0_9] : memref<3x128xf32, #tpu.memory_space<vmem>>, vector<3x128xf32>
    tpu.vector_store %arg5[%c0_8, %c0_9], %26 {strides = array<i32>} : memref<3x128xf32, #tpu.memory_space<vmem>>, vector<3x128xf32>,
    return
  }
  func.func @transform_0(%arg0: i32) -> (i32, i32) {
    %c0_i32 = arith.constant 0 : i32
    %c0_i32_0 = arith.constant 0 : i32
    %c0_i32_1 = arith.constant 0 : i32
    return %c0_i32, %c0_i32_0 : i32, i32
  }
  func.func @transform_1(%arg0: i32) -> (i32, i32) {
    %c0_i32 = arith.constant 0 : i32
    %c0_i32_0 = arith.constant 0 : i32
    %c0_i32_1 = arith.constant 0 : i32
    return %c0_i32, %c0_i32_0 : i32, i32
  }
  func.func @transform_2(%arg0: i32) -> (i32, i32) {
    %c0_i32 = arith.constant 0 : i32
    %c0_i32_0 = arith.constant 0 : i32
    %c0_i32_1 = arith.constant 0 : i32
    return %c0_i32, %c0_i32_0 : i32, i32
  }
  func.func @transform_3(%arg0: i32) -> (i32, i32) {
    %c0_i32 = arith.constant 0 : i32
    %c0_i32_0 = arith.constant 0 : i32
    return %c0_i32, %arg0 : i32, i32
  }
  func.func @transform_4(%arg0: i32) -> (i32, i32) {
    %c0_i32 = arith.constant 0 : i32
    %c0_i32_0 = arith.constant 0 : i32
    return %c0_i32, %arg0 : i32, i32
  }
}

</mosaic_0001>

<bundles_post_ra>
// kernel: tpu_custom_call.1
= control target key start
LH: loop header
LB: loop body
LE: loop exit
PB: predicated region body
PF: predicated region fallthrough
CT: control target
= control target key end

     0   :  { %9 = vsyncpa [#allocation3], 0  ;;  %s789_s0 = inlined_call_operand.vmem [shape: f32[32,3], index: 0, kind: input, shape index: {}]   ;;  %s790_s1 = inlined_call_operand.vmem [shape: f32[32,1], index: 1, kind: input, shape index: {}]   ;;  %s791_s2 = inlined_call_operand.vmem [shape: f32[3,32], index: 2, kind: input, shape index: {}]   ;;  %s792_s3 = inlined_call_operand.vmem [shape: f32[3,256], index: 3, kind: input, shape index: {}]   ;;  %s793_s4 = inlined_call_operand.hbm [shape: f32[3,256], index: 4, kind: output, shape index: {}]  }
   0x1   :  { %11 = vsyncpa [#allocation3 + $0x1], 0  ;;  %s658_s15 = smov 0   ;;  %s660_s16 = smov 0  }
   0x2   :  { %s662_s17 = smov 0   ;;  %s664_s18 = smov 0  }
   0x3 LB: > { %s679_s19 = sadd.s32 4294967295, %s625_s18   ;;  %s471_s20 = sadd.s32 4294967294, %s625_s18   ;;  %s625_s18 = sphi %s664_s18, %s799_s18   ;;  %s621_s17 = sphi %s662_s17, %s798_s17   ;;  %s617_s16 = sphi %s660_s16, %s797_s16   ;;  %s613_s15 = sphi %s658_s15, %s796_s15  }
   0x4   : > { %s683_s21 = sadd.s32 1, %s625_s18   ;;  %s113_s22 = sadd.s32 1, %s621_s17 }
   0x5   : > { %s110_s23 = ssub.s32 %s625_s18, %s683_s21  ;;  %p123_p0 = scmp.ne.s32.totalorder %s621_s17, %s617_s16 }
   0x6   : > { %p111_p1 = scmp.eq.s32.totalorder %s110_s23, 0  ;;  %p124_p2 = scmp.eq.s32.totalorder %s679_s19, 1 }
   0x7   : > { %p129_p3 = scmp.ne.s32.totalorder %s617_s16, %s613_s15  ;;  %p130_p4 = scmp.eq.s32.totalorder %s471_s20, 1 }
   0x8   : > { %s694_s24 = scalar_select %p111_p1, %s621_s17, %s113_s22  }
   0x9   : > { %p696_p5 = por %p124_p2, %p123_p0  ;;  %p700_p6 = por %p130_p4, %p129_p3 }
   0xa   : > { %p474_p7 = scmp.ge.s32.totalorder %s625_s18, 1  ;;  %p164_p8 = scmp.lt.s32.totalorder %s625_s18, 3 }
   0xc   : > { %p165_p9 = pnand %p474_p7, %p164_p8 }
   0xd   : > { %p189_p10 = scmp.lt.s32.totalorder (!%p165_p9), %s679_s19, 1  ;;  %s186_s7 = sand.u32 (!%p165_p9), 1, %s617_s16  }
   0xe   : > { %168 = sbr.rel (%p165_p9) target bundleno = 414 (0x19e), region = 36  ;;  %s475_s8 = sshll.u32 (!%p165_p9), %s186_s7, 2 }
   0xf   : > { %s188_s9 = scalar_lea.vmem (!%p165_p9), [#allocation2], %s475_s8  ;;  %s483_s11 = sshll.u32 (!%p165_p9), %s679_s19, 6 }
  0x10   : > { %s412_s10 = sshll.u32 (!%p165_p9), %s188_s9, 4  ;;  %s750_s14 = scalar_lea.hbm (!%p165_p9), %s793_s4, %s483_s11  ;;  %s745_s10 = int_to_ptr.vmem [resolvable:$true] %s412_s10 }
  0x11   : > { %s399_s20 = scalar_lea.sflag (!%p165_p9), [#allocation3], %s186_s7  ;;  %s565_s22 = scalar_lea.vmem (!%p165_p9), %s745_s10, 64 }
  0x12   : > { %p566_p11 = scmp.ne.s32.totalorder (!%p165_p9), %s745_s10, %s565_s22 }
  0x13   : > { %v196_v0 = vld [vmem:[%s789_s0 + $0x18] sm:$0xff]  ;;  %v195_v1 = vld [vmem:[%s789_s0 + $0x10] sm:$0xff]  ;;  %v627_v2 = vmov 1   ;;  %v628_v3 = vmov 0   ;;  %v194_v4 = vld [vmem:[%s789_s0 + $0x8] sm:$0xff]  ;;  %v629_v5 = vmov 2   ;;  %v223_v15 = vlaneseq }
  0x14   : > { %546 = vset.pattern.permute.xlu0 %v627_v2  ;;  %547 = vset.pattern.permute.xlu1 %v628_v3  ;;  %v193_v6 = vld [vmem:[%s789_s0] sm:$0xff]  ;;  %v199_v7 = vld [vmem:[%s790_s1 + $0x10] sm:$0xff]  ;;  %v200_v8 = vld [vmem:[%s790_s1 + $0x18] sm:$0xff]  ;;  %v630_v11 = vmov 0.0   ;;  %vm631_vm0 = vmmov 0   ;;  %s190_s23 = scalar_select %p189_p10, %s679_s19, 1 }
  0x15   : > { %244 = vperm.xlu0 %546, %v196_v0   ;;  %215 = vperm.xlu1 %547, %v195_v1   ;;  %v198_v9 = vld [vmem:[%s790_s1 + $0x8] sm:$0xff]  ;;  %v197_v10 = vld [vmem:[%s790_s1] sm:$0xff]  ;;  %v224_v17 = vshrl.u32 %v223_v15, 7  ;;  %vm323_vm1 = vcmask 261120   ;;  %p567_p12 = pnand %p566_p11, %p696_p5  ;;  %s632_s19 = smov [#allocation2]  }
  0x16   : > { %491 = vmatprep.subr.mxu0 %v630_v11  ;;  %499 = vmatprep.mubr.msk.f32.mxu0 %vm631_vm0, %v630_v11  ;;  %s476_s27 = sshll.u32 %s190_s23, 2  ;;  %s569_s23 = sshll.u32 %s632_s19, 4  ;;  %s570_s23 = int_to_ptr.vmem [resolvable:$false] %s569_s23 }
  0x17   : > { %s192_s30 = scalar_lea.vmem %s792_s3, %s476_s27  ;;  %v249_v19 = vsub.s32 1, %v224_v17  ;;  %v225_v20 = vsub.s32 0, %v224_v17  ;;  %v277_v25 = vsub.s32 2, %v224_v17  ;;  %p568_p13 = pneg %p567_p12 }
  0x18   : > { %v202_v21 = vld [vmem:[%s192_s30] sm:$0x7]  ;;  %s571_s27 = scalar_lea.vmem %s570_s23, 128  ;;  %p572_p0 = scmp.lt.s32.totalorder %s745_s10, %s570_s23 }
  0x19   : > { %553 = vset.pattern.permute.xlu0 %v629_v5  ;;  %548 = vset.pattern.permute.xlu1 %v627_v2  ;;  %v250_v24 = vrot.slane %v202_v21, %v249_v19  ;;  %v226_v26 = vrot.slane %v202_v21, %v225_v20  ;;  %v278_v28 = vrot.slane %v202_v21, %v277_v25  ;;  %p573_p1 = scmp.lt.s32.totalorder %s571_s27, %s565_s22 }
  0x1a   : > { %240 = vperm.xlu1 %548, %v195_v1   ;;  %264 = vperm.xlu0 %553, %v194_v4  }
  0x1b   : > { %p574_p2 = por %p573_p1, %p572_p0 }
  0x1d   : > { %p575_p3 = pnand %p574_p2, %p568_p13 }
  0x1e   : > { %549 = vset.pattern.permute.xlu1 %v629_v5  ;;  %554 = vset.pattern.permute.xlu0 %v628_v3 }
  0x1f   : > { %272 = vperm.xlu1 %549, %v196_v0   ;;  %220 = vperm.xlu0 %554, %v196_v0  }
  0x23   : > { %550 = vset.pattern.permute.xlu1 %v627_v2  ;;  %210 = vperm.xlu0 %554, %v194_v4  }
  0x24   : > { %236 = vperm.xlu1 %550, %v194_v4  }
  0x27   : > { %205 = vperm.xlu0 %554, %v193_v6  }
  0x28   : > { %551 = vset.pattern.permute.xlu1 %v629_v5 }
  0x29   : > { %268 = vperm.xlu1 %551, %v195_v1  }
  0x2b   : > { %303 = vperm.xlu0 %554, %v199_v7  }
  0x2d   : > { %552 = vset.pattern.permute.xlu1 %v627_v2 }
  0x2e   : > { %232 = vperm.xlu1 %552, %v193_v6  }
  0x32   : > { %555 = vset.pattern.permute.xlu1 %v629_v5 }
  0x33   : > { %260 = vperm.xlu1 %555, %v193_v6  }
  0x37   : > { %556 = vset.pattern.permute.xlu1 %v628_v3 }
  0x38   : > { %308 = vperm.xlu1 %556, %v200_v8   ;;  %v201_v8 = vld [vmem:[%s791_s2] sm:$0x7] }
  0x3c   : > { %298 = vperm.xlu1 %556, %v198_v9  }
  0x40   : > { %293 = vperm.xlu1 %556, %v197_v10  }
  0x90   : > { %v216_v12 = vpop.permute.xlu1 %215  ;;  %v245_v13 = vpop.permute.xlu0 %244 }
  0x91   : > { %v229_v31 = vmul.f32 %v226_v26, %v216_v12  ;;  %v254_v32 = vmul.f32 %v250_v24, %v245_v13 }
  0x95   : > { %v241_v14 = vpop.permute.xlu1 %240  ;;  %v265_v16 = vpop.permute.xlu0 %264 }
  0x96   : > { %v253_v27 = vmul.f32 %v250_v24, %v241_v14  ;;  %v280_v43 = vmul.f32 %v278_v28, %v265_v16 }
  0x98   : > { %v257_v35 = vadd.f32 %v253_v27, %v229_v31 }
  0x9a   : > { %v273_v18 = vpop.permute.xlu1 %272  ;;  %v221_v22 = vpop.permute.xlu0 %220 }
  0x9b   : > { %v230_v33 = vmul.f32 %v226_v26, %v221_v22  ;;  %v282_v42 = vmul.f32 %v278_v28, %v273_v18 }
  0x9d   : > { %v258_v38 = vadd.f32 %v254_v32, %v230_v33 }
  0x9e   : > { %v211_v30 = vpop.permute.xlu0 %210 }
  0x9f   : > { %v237_v23 = vpop.permute.xlu1 %236  ;;  %v228_v39 = vmul.f32 %v226_v26, %v211_v30  ;;  %v286_v47 = vadd.f32 %v282_v42, %v258_v38 }
  0xa0   : > { %v252_v40 = vmul.f32 %v250_v24, %v237_v23 }
  0xa1   : > { %v480_v53 = vadd.f32 -1.0, %v286_v47 }
  0xa2   : > { %v206_v36 = vpop.permute.xlu0 %205  ;;  %v256_v44 = vadd.f32 %v252_v40, %v228_v39 }
  0xa3   : > { %v227_v49 = vmul.f32 %v226_v26, %v206_v36 }
  0xa4   : > { %v269_v29 = vpop.permute.xlu1 %268  ;;  %v284_v54 = vadd.f32 %v280_v43, %v256_v44 }
  0xa5   : > { %v281_v34 = vmul.f32 %v278_v28, %v269_v29 }
  0xa6   : > { %v304_v48 = vpop.permute.xlu0 %303  ;;  %v478_v61 = vadd.f32 -1.0, %v284_v54 }
  0xa7   : > { %v285_v41 = vadd.f32 %v281_v34, %v257_v35 }
  0xa9   : > { %v233_v37 = vpop.permute.xlu1 %232  ;;  %v479_v45 = vadd.f32 -1.0, %v285_v41 }
  0xaa   : > { %v251_v50 = vmul.f32 %v250_v24, %v233_v37 }
  0xab   : > { %v313_v51 = vmul.f32 %v479_v45, %v304_v48 }
  0xac   : > { %v255_v56 = vadd.f32 %v251_v50, %v227_v49 }
  0xad   : > { %v319_v58 = vmul.f32 1.442695, %v313_v51 }
  0xae   : > { %v261_v46 = vpop.permute.xlu1 %260 }
  0xaf   : > { %v279_v52 = vmul.f32 %v278_v28, %v261_v46 }
  0xb1   : > { %v283_v59 = vadd.f32 %v279_v52, %v255_v56 }
  0xb3   : > { %v309_v55 = vpop.permute.xlu1 %308  ;;  %v477_v1 = vadd.f32 -1.0, %v283_v59 }
  0xb4   : > { %v314_v57 = vmul.f32 %v480_v53, %v309_v55 }
  0xb6   : > { %v321_v60 = vmul.f32 1.442695, %v314_v57 }
  0xb7   : > { %v299_v62 = vpop.permute.xlu1 %298 }
  0xb8   : > { %557 = vpow2.f32 %v321_v60  ;;  %v312_v63 = vmul.f32 %v478_v61, %v299_v62 }
  0xb9   : > { %559 = vpow2.f32 %v319_v58 }
  0xba   : > { %v317_v0 = vmul.f32 1.442695, %v312_v63 }
  0xbb   : > { %v294_v2 = vpop.permute.xlu1 %293 }
  0xbc   : > { %561 = vpow2.f32 %v317_v0  ;;  %v311_v3 = vmul.f32 %v477_v1, %v294_v2 }
  0xbe   : > { %v315_v4 = vmul.f32 1.442695, %v311_v3 }
  0xc0   : > { %563 = vpow2.f32 %v315_v4 }
  0xc5   : > { %v558_v5 = vpop.eup %557 }
  0xc6   : > { %492 = vmatpush3.msra.mxu0 %v558_v5  ;;  %v560_v6 = vpop.eup %559 }
  0xc7   : > { %493 = vmatprep.subr.mxu0 %v630_v11 }
  0xc8   : > { %494 = vmatpush3.msra.mxu0 %v560_v6 }
  0xc9   : > { %v562_v7 = vpop.eup %561  ;;  %495 = vmatprep.subr.mxu0 %v630_v11 }
  0xca   : > { %496 = vmatpush3.msra.mxu0 %v562_v7 }
  0xcb   : > { %497 = vmatprep.subr.mxu0 %v630_v11 }
  0xcd   : > { %v564_v9 = vpop.eup %563 }
  0xce   : > { %498 = vmatpush3.msra.mxu0 %v564_v9 }
  0xcf   : > { %500 = vmatmul.mubr.msk.f32.vlgmr.msra.gmra.mxu0 %vm323_vm1, %v201_v8 }
 0x18f   : > { %v393_v10 = vpop.f32.mrf.mxu0 }
 0x190   : > { %397 = vst [vmem:[%s188_s9] sm:$0x7] %v393_v10 }
 0x191   : > { %v501_v11 = vpop.f32.mrf.mxu0 }
 0x192   : > { %578 = shalt.err (!%p575_p3)
}
 0x193   : > { %s579_s28 = scalar_lea.hbm %s750_s14, 64  ;;  %s583_s5 = scalar_lea.hbm %s793_s4, 128 }
 0x194   : > { %p580_p4 = scmp.ne.s32.totalorder %s750_s14, %s579_s28  ;;  %p584_p9 = scmp.lt.s32.totalorder %s750_s14, %s793_s4 }
 0x195   : > { %p585_p10 = scmp.lt.s32.totalorder %s583_s5, %s579_s28 }
 0x196   : > { %p581_p7 = pnand %p580_p4, %p696_p5 }
 0x197   : > { %p586_p11 = por %p585_p10, %p584_p9 }
 0x198   : > { %p582_p8 = pneg %p581_p7 }
 0x19a   : > { %p587_p12 = pnand %p586_p11, %p582_p8 }
 0x19c   : > { %590 = shalt.err (!%p587_p12)
}
 0x19d   : > { %502 = dma.vmem_to_hbm [thread:$0]  (%p696_p5), %s745_s10, 64, %s750_s14, %s399_s20  }
 0x19e PF: > { %p508_p13 = scmp.ge.s32.totalorder %s625_s18, 2  ;;  %s424_s8 = sand.u32 1, %s613_s15  }
 0x19f   : > { %s425_s9 = scalar_lea.sflag [#allocation3], %s424_s8 }
 0x1a0   : > { %p505_p0 = pnand %p508_p13, %p700_p6 }
 0x1a2   : > { %p506_p1 = pneg %p505_p0 }
 0x1a4   : > { %608 = dma.done.wait (%p506_p1), %s425_s9, 64  }
 0x1a5   : > { %610 = vsyncadd (%p506_p1), %s425_s9, 4294967232  ;;  %p14_p2 = scmp.ge.s32.totalorder %s683_s21, 4   ;;  %s796_s15 = smov %s617_s16 }
 0x1a6   : > { %s797_s16 = smov %s621_s17  ;;  %s798_s17 = smov %s694_s24 }
 0x1a7   : > { %s799_s18 = smov %s683_s21  ;;  %16 = sbr.rel (!%p14_p2) target bundleno = 3 (0x3), region = 71 }
 0x1ac   :  { %430 = vsyncpa [#allocation3], 1 }
 0x1ad   :  { %432 = vsyncpa [#allocation3 + $0x1], 1 }

</bundles_post_ra>
